<compile_context>
chip_gen: v7x
topology: tpu7x:2x2x1
jax: 0.10.0
libtpu: 0.0.40
codegen_flags: <defaults>
</compile_context>

<pallas_src>
import functools

import jax
import jax.numpy as jnp
from jax.experimental import pallas as pl
from jax.experimental.pallas import tpu as pltpu


def policy_kernel(x_ref, w1_ref, w2_ref, wm_ref, b12_ref, head_ref, out_ref):
    bf16 = jnp.bfloat16
    x = x_ref[...]                       # (TB, num_inputs) f32

    b1 = b12_ref[0:1, :]                 # (1, H) f32
    b2 = b12_ref[1:2, :]                 # (1, H) f32
    bm = head_ref[0:1, :]                # (1, A) f32
    scale = head_ref[1:2, :]             # (1, A) f32
    bias = head_ref[2:3, :]              # (1, A) f32

    # layer 1: Linear + ReLU (bf16 MXU operands, f32 accumulate, f32 epilogue)
    h = jnp.dot(x.astype(bf16), w1_ref[...],
                preferred_element_type=jnp.float32) + b1
    h = jnp.maximum(h, 0.0)

    # layer 2: Linear + ReLU
    h = jnp.dot(h.astype(bf16), w2_ref[...],
                preferred_element_type=jnp.float32) + b2
    h = jnp.maximum(h, 0.0)

    # mean head: Linear -> tanh -> * action_scale + action_bias
    m = jnp.dot(h.astype(bf16), wm_ref[...],
                preferred_element_type=jnp.float32) + bm
    out_ref[...] = jnp.tanh(m) * scale + bias


@functools.partial(jax.jit, static_argnames=("block_b", "min_split"))
def deterministic_policy_forward(state, params, *, block_b=4096, min_split=512):
    """state: (B, num_inputs) f32 -> mean action: (B, action_dim) f32."""
    w1, w2, wm, b12, head = params
    B, num_inputs = state.shape
    H = w1.shape[1]
    A = wm.shape[1]

    # Batch tiling:
    #  - small B: one grid step with full-array blocks (latency path),
    #  - large B: >= 2 grid steps (so v7x megacore can shard the parallel batch
    #    axis over both TensorCores), tile capped at block_b rows, tile height a
    #    multiple of 8; the ragged last block is handled by Pallas (no host pad).
    if B <= min_split:
        tb = B
    else:
        half = -(-B // 2)                         # cdiv(B, 2)
        tb = min(block_b, ((half + 7) // 8) * 8)  # multiple of 8, >= 2 steps
    grid = (pl.cdiv(B, tb),)

    batch_map = lambda i: (i, 0)    # tile the batch axis
    fixed_map = lambda i: (0, 0)    # weights / biases resident across grid steps

    flops = 2 * B * (num_inputs * H + H * H + H * A) + 6 * B * (H + A)
    bytes_accessed = (state.size * state.dtype.itemsize
                      + sum(int(p.size) * p.dtype.itemsize for p in params)
                      + B * A * 4)
    cost = pl.CostEstimate(flops=flops,
                           transcendentals=B * A,       # tanh
                           bytes_accessed=bytes_accessed)

    out = pl.pallas_call(
        policy_kernel,
        out_shape=jax.ShapeDtypeStruct((B, A), jnp.float32),
        grid_spec=pltpu.PrefetchScalarGridSpec(
            num_scalar_prefetch=0,
            grid=grid,
            in_specs=[
                pl.BlockSpec((tb, num_inputs), batch_map),   # activations
                pl.BlockSpec(w1.shape, fixed_map),           # (num_inputs, H) bf16
                pl.BlockSpec(w2.shape, fixed_map),           # (H, H) bf16
                pl.BlockSpec(wm.shape, fixed_map),           # (H, A) bf16
                pl.BlockSpec(b12.shape, fixed_map),          # (2, H) f32  [b1; b2]
                pl.BlockSpec(head.shape, fixed_map),         # (3, A) f32  [bm; scale; bias]
            ],
            out_specs=pl.BlockSpec((tb, A), batch_map),      # (B, A), exact shape
        ),
        compiler_params=pltpu.CompilerParams(
            dimension_semantics=("parallel",)),
        cost_estimate=cost,
    )(state, w1, w2, wm, b12, head)

    return out


def init_params(key, num_inputs, action_dim, hidden_dim, action_space=None):
    """Xavier-uniform weights (stored [in, out], bf16) + zero f32 biases,
    matching weights_init_; action_scale/bias from action_space (or 1.0 / 0.0).
    Biases are consolidated: b12 = [b1; b2], head = [bm; scale; bias]."""

    def xavier(k, fan_in, fan_out):
        bound = jnp.sqrt(6.0 / (fan_in + fan_out))
        w = jax.random.uniform(k, (fan_in, fan_out), jnp.float32,
                               minval=-bound, maxval=bound)
        return w.astype(jnp.bfloat16)

    k1, k2, k3 = jax.random.split(key, 3)
    w1 = xavier(k1, num_inputs, hidden_dim)
    w2 = xavier(k2, hidden_dim, hidden_dim)
    wm = xavier(k3, hidden_dim, action_dim)

    b12 = jnp.zeros((2, hidden_dim), jnp.float32)            # [b1; b2]
    bm = jnp.zeros((1, action_dim), jnp.float32)

    if action_space is None:
        scale = jnp.ones((1, action_dim), jnp.float32)
        bias = jnp.zeros((1, action_dim), jnp.float32)
    else:
        low, high = action_space
        scale = ((high - low) / 2.0).reshape(1, action_dim).astype(jnp.float32)
        bias = ((high + low) / 2.0).reshape(1, action_dim).astype(jnp.float32)

    head = jnp.concatenate([bm, scale, bias], axis=0)        # (3, A)
    return (w1, w2, wm, b12, head)


def reference_forward(state, params):
    """Pure-JAX f32 reference of the PyTorch forward (for verification)."""
    w1, w2, wm, b12, head = params
    b1, b2 = b12[0:1, :], b12[1:2, :]
    bm, scale, bias = head[0:1, :], head[1:2, :], head[2:3, :]
    h = jax.nn.relu(state @ w1.astype(jnp.float32) + b1)
    h = jax.nn.relu(h @ w2.astype(jnp.float32) + b2)
    m = jnp.tanh(h @ wm.astype(jnp.float32) + bm)
    return m * scale + bias


if __name__ == "__main__":
    num_inputs, action_dim, hidden_dim = 24, 8, 32

    key = jax.random.PRNGKey(0)
    k_state, k_params, k_big = jax.random.split(key, 3)
    params = init_params(k_params, num_inputs, action_dim, hidden_dim)

    # small-batch case (single grid step, full-array blocks, latency path)
    B = 2
    state = jax.random.normal(k_state, (B, num_inputs), jnp.float32)
    mean = jax.block_until_ready(deterministic_policy_forward(state, params))
    ref = reference_forward(state, params)
    assert mean.shape == (B, action_dim)
    assert jnp.allclose(mean, ref, atol=3e-2, rtol=3e-2), "small-batch mismatch"

    # larger ragged batch: >= 2 grid steps, ragged last block (no host pad/slice),
    # resident weights across steps
    Bb = 1037
    state_big = jax.random.normal(k_big, (Bb, num_inputs), jnp.float32)
    mean_big = jax.block_until_ready(deterministic_policy_forward(state_big, params))
    ref_big = reference_forward(state_big, params)
    assert mean_big.shape == (Bb, action_dim)
    assert jnp.allclose(mean_big, ref_big, atol=3e-2, rtol=3e-2), "tiled-batch mismatch"

    print("KERNEL_OK")
</pallas_src>

<mosaic_0001>
module attributes {stable_mosaic.version = 11 : i64} {
  func.func @policy_kernel(%arg0: i32, %arg1: memref<2x24xf32, #tpu.memory_space<vmem>>, %arg2: memref<24x32xbf16, #tpu.memory_space<vmem>>, %arg3: memref<32x32xbf16, #tpu.memory_space<vmem>>, %arg4: memref<32x8xbf16, #tpu.memory_space<vmem>>, %arg5: memref<2x32xf32, #tpu.memory_space<vmem>>, %arg6: memref<3x8xf32, #tpu.memory_space<vmem>>, %arg7: memref<2x8xf32, #tpu.memory_space<vmem>>) attributes {dimension_semantics = [#tpu.dimension_semantics<parallel>], iteration_bounds = array<i64: 1>, scalar_prefetch = 0 : i64, scratch_operands = 0 : i64, tpu.core_type = #tpu.core_type<tc>, window_params = [{transform_indices = @transform_0, window_bounds = array<i64: 2, 24>}, {pipeline_mode = #tpu.pipeline_mode<synchronous>, transform_indices = @transform_1, window_bounds = array<i64: 24, 32>}, {pipeline_mode = #tpu.pipeline_mode<synchronous>, transform_indices = @transform_2, window_bounds = array<i64: 32, 32>}, {pipeline_mode = #tpu.pipeline_mode<synchronous>, transform_indices = @transform_3, window_bounds = array<i64: 32, 8>}, {pipeline_mode = #tpu.pipeline_mode<synchronous>, transform_indices = @transform_4, window_bounds = array<i64: 2, 32>}, {pipeline_mode = #tpu.pipeline_mode<synchronous>, transform_indices = @transform_5, window_bounds = array<i64: 3, 8>}, {transform_indices = @transform_6, window_bounds = array<i64: 2, 8>}]} {
    %c0 = arith.constant 0 : index
    %c0_0 = arith.constant 0 : index
    %0 = vector.load %arg1[%c0, %c0_0] : memref<2x24xf32, #tpu.memory_space<vmem>>, vector<2x24xf32>
    %c0_1 = arith.constant 0 : index
    %c0_2 = arith.constant 0 : index
    %1 = vector.load %arg5[%c0_1, %c0_2] : memref<2x32xf32, #tpu.memory_space<vmem>>, vector<1x32xf32>
    %c1 = arith.constant 1 : index
    %c0_3 = arith.constant 0 : index
    %2 = vector.load %arg5[%c1, %c0_3] : memref<2x32xf32, #tpu.memory_space<vmem>>, vector<1x32xf32>
    %c0_4 = arith.constant 0 : index
    %c0_5 = arith.constant 0 : index
    %3 = vector.load %arg6[%c0_4, %c0_5] : memref<3x8xf32, #tpu.memory_space<vmem>>, vector<1x8xf32>
    %c1_6 = arith.constant 1 : index
    %c0_7 = arith.constant 0 : index
    %4 = vector.load %arg6[%c1_6, %c0_7] : memref<3x8xf32, #tpu.memory_space<vmem>>, vector<1x8xf32>
    %c2 = arith.constant 2 : index
    %c0_8 = arith.constant 0 : index
    %5 = vector.load %arg6[%c2, %c0_8] : memref<3x8xf32, #tpu.memory_space<vmem>>, vector<1x8xf32>
    %6 = arith.truncf %0 : vector<2x24xf32> to vector<2x24xbf16>
    %c0_9 = arith.constant 0 : index
    %c0_10 = arith.constant 0 : index
    %7 = vector.load %arg2[%c0_9, %c0_10] : memref<24x32xbf16, #tpu.memory_space<vmem>>, vector<24x32xbf16>
    %cst = arith.constant dense<0.000000e+00> : vector<2x32xf32>
    %8 = tpu.matmul %6, %7, %cst {dimension_numbers = #tpu.dot_dimension_numbers<[1], [0], [0], [1], [0, 0, 1, 1], [], []>} : vector<2x24xbf16>, vector<24x32xbf16>, vector<2x32xf32> -> vector<2x32xf32>
    %9 = vector.broadcast %1 : vector<1x32xf32> to vector<2x32xf32>
    %10 = arith.addf %8, %9 : vector<2x32xf32>
    %cst_11 = arith.constant 0.000000e+00 : f32
    %11 = vector.broadcast %cst_11 : f32 to vector<2x32xf32>
    %12 = arith.maximumf %10, %11 : vector<2x32xf32>
    %13 = arith.truncf %12 : vector<2x32xf32> to vector<2x32xbf16>
    %c0_12 = arith.constant 0 : index
    %c0_13 = arith.constant 0 : index
    %14 = vector.load %arg3[%c0_12, %c0_13] : memref<32x32xbf16, #tpu.memory_space<vmem>>, vector<32x32xbf16>
    %cst_14 = arith.constant dense<0.000000e+00> : vector<2x32xf32>
    %15 = tpu.matmul %13, %14, %cst_14 {dimension_numbers = #tpu.dot_dimension_numbers<[1], [0], [0], [1], [0, 0, 1, 1], [], []>} : vector<2x32xbf16>, vector<32x32xbf16>, vector<2x32xf32> -> vector<2x32xf32>
    %16 = vector.broadcast %2 : vector<1x32xf32> to vector<2x32xf32>
    %17 = arith.addf %15, %16 : vector<2x32xf32>
    %cst_15 = arith.constant 0.000000e+00 : f32
    %18 = vector.broadcast %cst_15 : f32 to vector<2x32xf32>
    %19 = arith.maximumf %17, %18 : vector<2x32xf32>
    %20 = arith.truncf %19 : vector<2x32xf32> to vector<2x32xbf16>
    %c0_16 = arith.constant 0 : index
    %c0_17 = arith.constant 0 : index
    %21 = vector.load %arg4[%c0_16, %c0_17] : memref<32x8xbf16, #tpu.memory_space<vmem>>, vector<32x8xbf16>
    %cst_18 = arith.constant dense<0.000000e+00> : vector<2x8xf32>
    %22 = tpu.matmul %20, %21, %cst_18 {dimension_numbers = #tpu.dot_dimension_numbers<[1], [0], [0], [1], [0, 0, 1, 1], [], []>} : vector<2x32xbf16>, vector<32x8xbf16>, vector<2x8xf32> -> vector<2x8xf32>
    %23 = vector.broadcast %3 : vector<1x8xf32> to vector<2x8xf32>
    %24 = arith.addf %22, %23 : vector<2x8xf32>
    %25 = math.tanh %24 : vector<2x8xf32>
    %26 = vector.broadcast %4 : vector<1x8xf32> to vector<2x8xf32>
    %27 = arith.mulf %25, %26 : vector<2x8xf32>
    %28 = vector.broadcast %5 : vector<1x8xf32> to vector<2x8xf32>
    %29 = arith.addf %27, %28 : vector<2x8xf32>
    %c0_19 = arith.constant 0 : index
    %c0_20 = arith.constant 0 : index
    %30 = vector.load %arg7[%c0_19, %c0_20] : memref<2x8xf32, #tpu.memory_space<vmem>>, vector<2x8xf32>
    tpu.vector_store %arg7[%c0_19, %c0_20], %29 {strides = array<i32>} : memref<2x8xf32, #tpu.memory_space<vmem>>, vector<2x8xf32>,
    return
  }
  func.func @transform_0(%arg0: i32) -> (i32, i32) {
    %c0_i32 = arith.constant 0 : i32
    %c0_i32_0 = arith.constant 0 : i32
    return %arg0, %c0_i32 : i32, i32
  }
  func.func @transform_1(%arg0: i32) -> (i32, i32) {
    %c0_i32 = arith.constant 0 : i32
    %c0_i32_0 = arith.constant 0 : i32
    %c0_i32_1 = arith.constant 0 : i32
    return %c0_i32, %c0_i32_0 : i32, i32
  }
  func.func @transform_2(%arg0: i32) -> (i32, i32) {
    %c0_i32 = arith.constant 0 : i32
    %c0_i32_0 = arith.constant 0 : i32
    %c0_i32_1 = arith.constant 0 : i32
    return %c0_i32, %c0_i32_0 : i32, i32
  }
  func.func @transform_3(%arg0: i32) -> (i32, i32) {
    %c0_i32 = arith.constant 0 : i32
    %c0_i32_0 = arith.constant 0 : i32
    %c0_i32_1 = arith.constant 0 : i32
    return %c0_i32, %c0_i32_0 : i32, i32
  }
  func.func @transform_4(%arg0: i32) -> (i32, i32) {
    %c0_i32 = arith.constant 0 : i32
    %c0_i32_0 = arith.constant 0 : i32
    %c0_i32_1 = arith.constant 0 : i32
    return %c0_i32, %c0_i32_0 : i32, i32
  }
  func.func @transform_5(%arg0: i32) -> (i32, i32) {
    %c0_i32 = arith.constant 0 : i32
    %c0_i32_0 = arith.constant 0 : i32
    %c0_i32_1 = arith.constant 0 : i32
    return %c0_i32, %c0_i32_0 : i32, i32
  }
  func.func @transform_6(%arg0: i32) -> (i32, i32) {
    %c0_i32 = arith.constant 0 : i32
    %c0_i32_0 = arith.constant 0 : i32
    return %arg0, %c0_i32 : i32, i32
  }
}

</mosaic_0001>

<bundles_post_ra>
// kernel: deterministic_policy_forward.1
= control target key start
LH: loop header
LB: loop body
LE: loop exit
PB: predicated region body
PF: predicated region fallthrough
CT: control target
= control target key end

     0   :  { %11 = vsyncpa [#allocation3], 0  ;;  %s476_s0 = inlined_call_operand.vmem [shape: f32[2,24], index: 0, kind: input, shape index: {}]   ;;  %s477_s1 = inlined_call_operand.hbm [shape: bf16[24,32], index: 1, kind: input, shape index: {}]   ;;  %s478_s2 = inlined_call_operand.vmem [shape: bf16[32,32], index: 2, kind: input, shape index: {}]   ;;  %s479_s3 = inlined_call_operand.vmem [shape: bf16[32,8], index: 3, kind: input, shape index: {}]   ;;  %s480_s4 = inlined_call_operand.vmem [shape: f32[2,32], index: 4, kind: input, shape index: {}]   ;;  %s481_s5 = inlined_call_operand.vmem [shape: f32[3,8], index: 5, kind: input, shape index: {}]   ;;  %s482_s6 = inlined_call_operand.hbm [shape: f32[2,8], index: 6, kind: output, shape index: {}]  }
   0x1   :  { %12 = vsyncpa [#allocation4], 0  ;;  %s378_s21 = smov [#allocation2]   ;;  %s330_s25 = scalar_lea.hbm %s477_s1, 192 }
   0x2   :  { %s20_s22 = sshll.u32 %s378_s21, 4  ;;  %p331_p0 = scmp.ne.s32.totalorder %s477_s1, %s330_s25  ;;  %s21_s22 = int_to_ptr.vmem [resolvable:$true] %s20_s22 }
   0x3   :  { %p334_p1 = scmp.lt.u32.totalorder %s330_s25, %s477_s1 }
   0x5   :  { %p336_p2 = pnand %p334_p1, %p331_p0 }
   0x7   :  { %339 = shalt.err (!%p336_p2)
}
   0x8   :  { %s340_s30 = scalar_lea.vmem %s21_s22, 192  ;;  %p345_p4 = scmp.lt.s32.totalorder %s21_s22, %s21_s22 }
   0x9   :  { %p341_p3 = scmp.ne.s32.totalorder %s21_s22, %s340_s30  ;;  %p346_p5 = scmp.lt.s32.totalorder %s340_s30, %s340_s30 }
   0xb   :  { %p347_p6 = por %p346_p5, %p345_p4 }
   0xd   :  { %p348_p7 = pnand %p347_p6, %p341_p3 }
   0xf   :  { %351 = shalt.err (!%p348_p7)
}
  0x10   :  { %s379_s7 = smov 64   ;;  %s380_s8 = smov 4  }
  0x11   :  { %26 = dma.hbm_to_vmem [thread:$0]  %s477_s1, 192, %s21_s22, [#allocation3], %s379_s7, %s379_s7, %s380_s8  }
  0x12   :  { %374 = dma.done.wait [#allocation3], 192  }
  0x13   :  { %375 = vsyncadd [#allocation3], 4294967104  ;;  %v381_v0 = vmov 0.0   ;;  %vm382_vm0 = vmmov 0   ;;  %v322_v1 = vld [vmem:[#allocation2] sm:$0xff]   ;;  %vm66_vm1 = vcmask 1043456  }
  0x14   :  { %292 = vmatprep.subr.bf16.mxu0 %v381_v0  ;;  %296 = vmatprep.mubr.msk.bf16.mxu0 %vm382_vm0, %v381_v0  ;;  %v323_v2 = vld [vmem:[#allocation2 + $0x8] ss:$0 sps:$4 sm:$0xff]   ;;  %v39_v3 = vld [vmem:[%s476_s0] sm:$0x3]  ;;  %vm62_vm2 = vcmask 195584   ;;  %vm132_vm3 = vcmask 261120  }
  0x15   :  { %300 = vmatprep.subr.bf16.mxu1 %v381_v0  ;;  %304 = vmatprep.mubr.msk.bf16.mxu1 %vm382_vm0, %v381_v0  ;;  %v68_v4 = vsel %vm66_vm1, %v323_v2, 0  ;;  %v45_v5 = vpack.c.bf16 %v39_v3, %v39_v3  ;;  %v324_v6 = vld [vmem:[%s478_s2] sm:$0xff]   ;;  %v325_v7 = vld [vmem:[%s478_s2 + $0x8] sm:$0xff]   ;;  %s383_s26 = smov [#allocation5]   ;;  %vm252_vm4 = vcmask 58368  }
  0x16   :  { %293 = vmatpush3.bf16.msra.mxu0 %v322_v1  ;;  %301 = vmatpush3.bf16.msra.mxu1 %v324_v6  ;;  %v326_v8 = vld [vmem:[%s479_s3] sm:$0xff]   ;;  %v327_v17 = vld [vmem:[%s479_s3 + $0x8] sm:$0xff]   ;;  %s260_s27 = sshll.u32 %s383_s26, 4  ;;  %s261_s27 = int_to_ptr.vmem [resolvable:$true] %s260_s27 }
  0x17   :  { %294 = vmatprep.subr.bf16.mxu0 %v381_v0  ;;  %302 = vmatprep.subr.bf16.mxu1 %v381_v0  ;;  %v269_v9 = vld [vmem:[%s480_s4] ss:$0 sm:$0xff]  ;;  %v273_v18 = vld [vmem:[%s480_s4 + $0x1] ss:$0 sm:$0xff]  ;;  %v282_v34 = vld [vmem:[%s481_s5 + $0x2] ss:$0 sm:$0xff]  ;;  %p357_p9 = scmp.lt.s32.totalorder %s261_s27, %s261_s27 }
  0x18   :  { %v277_v26 = vld [vmem:[%s481_s5] ss:$0 sm:$0xff]  ;;  %v281_v32 = vld [vmem:[%s481_s5 + $0x1] ss:$0 sm:$0xff]  ;;  %s352_s28 = scalar_lea.vmem %s261_s27, 32 }
  0x19   :  { %p353_p8 = scmp.ne.s32.totalorder %s261_s27, %s352_s28  ;;  %p358_p10 = scmp.lt.s32.totalorder %s352_s28, %s352_s28 }
  0x1a   :  { %295 = vmatpush3.bf16.msra.mxu0 %v68_v4  ;;  %303 = vmatpush3.bf16.msra.mxu1 %v325_v7 }
  0x1b   :  { %308 = vmatprep.subr.bf16.mxu0 %v381_v0  ;;  %p359_p11 = por %p358_p10, %p357_p9 }
  0x1d   :  { %297 = vmatmul.mubr.msk.bf16.vlgmr.msra.gmra.mrb[0].mxu0 %vm62_vm2, %v45_v5  ;;  %p360_p12 = pnand %p359_p11, %p353_p8 }
  0x1e   :  { %312 = vmatprep.mubr.msk.bf16.mxu0 %vm382_vm0, %v381_v0  ;;  %309 = vmatpush3.bf16.msra.mxu0 %v326_v8 }
  0x1f   :  { %310 = vmatprep.subr.bf16.mxu0 %v381_v0 }
  0x22   :  { %311 = vmatpush3.bf16.msra.mxu0 %v327_v17 }
  0xf0   :  { %v104_v10 = vpop.f32.mrb[0].mxu0 }
  0xf1   :  { %v105_v11 = vadd.f32 %v269_v9, %v104_v10  ;;  %v298_v12 = vpop.f32.mrb[1].mxu0 }
  0xf2   :  { %v107_v13 = vpop.f32.mrb[2].mxu0 }
  0xf3   :  { %v110_v14 = vmax.f32 %v105_v11, 0.0  ;;  %v299_v15 = vpop.f32.mrb[3].mxu0 }
  0xf5   :  { %v111_v16 = vpack.c.bf16 %v110_v14, %v110_v14 }
  0xf7   :  { %305 = vmatmul.mubr.msk.bf16.vlgmr.msra.gmra.mrb[0].mxu1 %vm132_vm3, %v111_v16 }
 0x1ca   :  { %v170_v19 = vpop.f32.mrb[0].mxu1 }
 0x1cb   :  { %v171_v20 = vadd.f32 %v273_v18, %v170_v19  ;;  %v306_v21 = vpop.f32.mrb[1].mxu1 }
 0x1cc   :  { %v173_v22 = vpop.f32.mrb[2].mxu1 }
 0x1cd   :  { %v176_v23 = vmax.f32 %v171_v20, 0.0  ;;  %v307_v24 = vpop.f32.mrb[3].mxu1 }
 0x1cf   :  { %v177_v25 = vpack.c.bf16 %v176_v23, %v176_v23 }
 0x1d1   :  { %313 = vmatmul.mubr.msk.bf16.vlgmr.msra.gmra.mrb[4].mxu0 %vm132_vm3, %v177_v25 }
 0x2a4   :  { %v235_v27 = vpop.f32.mrb[4].mxu0 }
 0x2a5   :  { %v236_v28 = vadd.f32 %v277_v26, %v235_v27  ;;  %v314_v29 = vpop.f32.mrb[5].mxu0 }
 0x2a6   :  { %v238_v30 = vpop.f32.mrb[6].mxu0 }
 0x2a7   :  { %328 = vtanh.f32 %v236_v28  ;;  %v315_v31 = vpop.f32.mrb[7].mxu0 }
 0x2b1   :  { %v329_v33 = vpop.eup %328 }
 0x2b2   :  { %v246_v35 = vmul.f32 %v329_v33, %v281_v32 }
 0x2b4   :  { %v251_v36 = vadd.f32 %v282_v34, %v246_v35 }
 0x2b6   :  { %253 = vst.msk [vmem:[#allocation5] sm:$0x3] %vm252_vm4, %v251_v36 }
 0x2b7   :  { %363 = shalt.err (!%p360_p12)
}
 0x2b8   :  { %s364_s7 = scalar_lea.hbm %s482_s6, 32 }
 0x2b9   :  { %p365_p13 = scmp.ne.s32.totalorder %s482_s6, %s364_s7  ;;  %p368_p0 = scmp.lt.u32.totalorder %s364_s7, %s482_s6 }
 0x2bb   :  { %p370_p1 = pnand %p368_p0, %p365_p13 }
 0x2bd   :  { %373 = shalt.err (!%p370_p1)
}
 0x2be   :  { %263 = dma.vmem_to_hbm [thread:$0]  %s261_s27, 32, %s482_s6, [#allocation4]  }
 0x2bf   :  { %376 = dma.done.wait [#allocation4], 32  }
 0x2c0   :  { %377 = vsyncadd [#allocation4], 4294967264 }
 0x2c1   :  { %267 = vsyncpa [#allocation3], 1 }
 0x2c2   :  { %268 = vsyncpa [#allocation4], 1 }

</bundles_post_ra>
